<compile_context>
chip_gen: v7x
topology: tpu7x:2x2x1
jax: 0.10.0
libtpu: 0.0.40
codegen_flags: <defaults>
</compile_context>

<pallas_src>
import functools
import math

import jax
import jax.numpy as jnp
from jax.experimental import pallas as pl
from jax.experimental.pallas import tpu as pltpu


# ---------------------------------------------------------------------------
# VMEM budget (per generation: ~96 MiB on v5e/v6e, ~48 MiB on v7x)
# ---------------------------------------------------------------------------
def _vmem_limit_bytes():
    phys = 64 * 1024 * 1024                     # conservative default (v7x physical)
    try:
        cap = getattr(pltpu.get_tpu_info(), "vmem_capacity_bytes", None)
        if cap:
            phys = int(cap)
    except Exception:
        pass
    return min(phys * 3 // 4, 96 * 1024 * 1024)


_VMEM_LIMIT = _vmem_limit_bytes()
_VMEM_BUDGET = _VMEM_LIMIT * 3 // 4             # headroom for internal scratch


def _recip(x):
    # EUP approximate reciprocal (free slot) + one Newton step (2 cheap VPU ops
    # on a (rows, 1) column) -> exact-division accuracy without a VPU divide.
    r = pl.reciprocal(x, approx=True)
    return r * (2.0 - x * r)


def _round_down(v, align):
    return max(align, (v // align) * align)


def _reduction_tile(dim, pref=512, align=128):
    """Tile for a reduction axis: must divide `dim` exactly (partial blocks on
    a reduction axis would feed garbage padding into the accumulator)."""
    if dim <= pref:
        return dim
    t = _round_down(pref, align)
    while t >= align:
        if dim % t == 0:
            return t
        t -= align
    return dim


# ---------------------------------------------------------------------------
# Fused (optional LayerNorm) + Linear (+ bias, optional ReLU, optional residual)
# ---------------------------------------------------------------------------
def _fused_linear_kernel(*refs, has_ln, activation, has_residual,
                         eps, inv_f, inv_fm1):
    it = iter(refs)
    x_ref = next(it)
    if has_ln:
        g_ref = next(it)
        bln_ref = next(it)
    w_ref = next(it)
    b_ref = next(it)
    r_ref = next(it) if has_residual else None
    o_ref = next(it)

    x = x_ref[...].astype(jnp.float32)
    if has_ln:
        # PyTorch-spec LayerNorm: unbiased (N-1) variance, eps added to std.
        mean = jnp.sum(x, axis=-1, keepdims=True) * inv_f
        diff = x - mean
        var = jnp.sum(diff * diff, axis=-1, keepdims=True) * inv_fm1
        inv = _recip(jnp.sqrt(var) + eps)
        x = diff * inv * g_ref[...] + bln_ref[...]

    acc = jnp.dot(x.astype(w_ref.dtype), w_ref[...],
                  preferred_element_type=jnp.float32)
    acc = acc + b_ref[...]
    if activation == "relu":
        acc = jnp.maximum(acc, 0.0)
    if has_residual:
        acc = acc + r_ref[...].astype(jnp.float32)
    o_ref[...] = acc.astype(o_ref.dtype)


def _pick_linear_tiles(M, K, N, itemsize, has_residual):
    # (8,128)-aligned tiles with cdiv partial blocks; full dim when it is small.
    tm = M if M <= 512 else 512
    tn = N if N <= 512 else 512

    def footprint(tm_, tn_):
        nres = tm_ * tn_ if has_residual else 0
        # double-buffered x, weight, bias, residual, out blocks
        return 2 * itemsize * (tm_ * K + K * tn_ + tn_ + nres + tm_ * tn_)

    while footprint(tm, tn) > _VMEM_BUDGET:
        if tm > 64 and (tm >= tn or tn <= 128):
            tm = _round_down(tm // 2, 8)
        elif tn > 128:
            tn = _round_down(tn // 2, 128)
        else:
            break
    return tm, tn


def fused_linear(x, w, b, *, ln_gamma=None, ln_beta=None, ln_eps=1e-6,
                 activation=None, residual=None):
    """y = act(LN?(x) @ w + b) (+ residual).  x:(M,K)  w:(K,N)  b:(N,)."""
    M, K = x.shape
    Kw, N = w.shape
    assert K == Kw
    has_ln = ln_gamma is not None
    has_residual = residual is not None

    b2 = b.reshape(1, N).astype(jnp.float32)
    tm, tn = _pick_linear_tiles(M, K, N, x.dtype.itemsize, has_residual)
    nm, nn = pl.cdiv(M, tm), pl.cdiv(N, tn)

    # Operand residency: the larger operand's block stays constant along the
    # inner grid axis so it is not re-streamed from HBM every step.
    weight_resident = K * N >= M * K
    if weight_resident:
        grid = (nn, nm)
        x_map = lambda j, i: (i, 0)
        w_map = lambda j, i: (0, j)
        col_map = lambda j, i: (0, j)
        mn_map = lambda j, i: (i, j)
        row_map = lambda j, i: (0, 0)
    else:
        grid = (nm, nn)
        x_map = lambda i, j: (i, 0)
        w_map = lambda i, j: (0, j)
        col_map = lambda i, j: (0, j)
        mn_map = lambda i, j: (i, j)
        row_map = lambda i, j: (0, 0)

    in_specs = [pl.BlockSpec((tm, K), x_map)]
    args = [x]
    if has_ln:
        in_specs += [pl.BlockSpec((1, K), row_map),
                     pl.BlockSpec((1, K), row_map)]
        args += [ln_gamma.reshape(1, K).astype(jnp.float32),
                 ln_beta.reshape(1, K).astype(jnp.float32)]
    in_specs += [pl.BlockSpec((K, tn), w_map), pl.BlockSpec((1, tn), col_map)]
    args += [w, b2]
    if has_residual:
        in_specs.append(pl.BlockSpec((tm, tn), mn_map))
        args.append(residual)

    kernel = functools.partial(
        _fused_linear_kernel, has_ln=has_ln, activation=activation,
        has_residual=has_residual, eps=float(ln_eps),
        inv_f=1.0 / K, inv_fm1=1.0 / max(K - 1, 1))

    return pl.pallas_call(
        kernel,
        out_shape=jax.ShapeDtypeStruct((M, N), x.dtype),
        grid_spec=pltpu.PrefetchScalarGridSpec(
            num_scalar_prefetch=0,
            grid=grid,
            in_specs=in_specs,
            out_specs=pl.BlockSpec((tm, tn), mn_map),
        ),
        compiler_params=pltpu.CompilerParams(
            dimension_semantics=("parallel", "parallel"),
            vmem_limit_bytes=_VMEM_LIMIT,
        ),
    )(*args)


# ---------------------------------------------------------------------------
# Attention: one batch element per grid step, all heads in-kernel, no transposes
# ---------------------------------------------------------------------------
def _attention_kernel(qkv_ref, m_ref, o_ref, *, H, dk, D, scale):
    keep = m_ref[0, 0] != 0                      # (S, S), nonzero = attend
    outs = []
    for h in range(H):                           # static unroll over heads
        q = qkv_ref[0, :, h * dk:(h + 1) * dk].astype(jnp.float32)
        k = qkv_ref[0, :, D + h * dk:D + (h + 1) * dk].astype(jnp.float32)
        v = qkv_ref[0, :, 2 * D + h * dk:2 * D + (h + 1) * dk]
        s = jax.lax.dot_general(q, k, (((1,), (1,)), ((), ())),
                                preferred_element_type=jnp.float32) * scale
        s = jnp.where(keep, s, jnp.float32(-1e9))   # masked_fill(mask==0, -1e9)
        mx = jnp.max(s, axis=-1, keepdims=True)
        p = jnp.exp(s - mx)
        p = p * _recip(jnp.sum(p, axis=-1, keepdims=True))
        outs.append(jnp.dot(p.astype(v.dtype), v,
                            preferred_element_type=jnp.float32))
    # Single lane-dense store of the whole (S, D) context slab (head-major
    # along the last dim == the reference's transpose+reshape layout).
    o_ref[0, :, :] = jnp.concatenate(outs, axis=-1).astype(o_ref.dtype)


def _attention(qkv, mask, *, heads, dk, scale):
    """qkv: (B, S, 3D) = Q|K|V sections (each head-major). mask: (B,1,S,S)."""
    B, S, threeD = qkv.shape
    D = threeD // 3
    # TODO(synk): switch to a flash-style kv-tiled online-softmax kernel for
    # long sequences; here the (S,S) scores are materialized per head.
    return pl.pallas_call(
        functools.partial(_attention_kernel, H=heads, dk=dk, D=D, scale=scale),
        out_shape=jax.ShapeDtypeStruct((B, S, D), qkv.dtype),
        grid_spec=pltpu.PrefetchScalarGridSpec(
            num_scalar_prefetch=0,
            grid=(B,),
            in_specs=[
                pl.BlockSpec((1, S, threeD), lambda b: (b, 0, 0)),
                pl.BlockSpec((1, 1, S, S), lambda b: (b, 0, 0, 0)),
            ],
            out_specs=pl.BlockSpec((1, S, D), lambda b: (b, 0, 0)),
        ),
        compiler_params=pltpu.CompilerParams(
            dimension_semantics=("parallel",),
            vmem_limit_bytes=_VMEM_LIMIT,
        ),
    )(qkv, mask)


# ---------------------------------------------------------------------------
# Fused LN2 + position-wise FFN + residual (DFF as in-VMEM reduction axis)
# ---------------------------------------------------------------------------
def _ln_ffn_kernel(x_ref, g_ref, bln_ref, w1_ref, b1_ref, w2_ref, b2_ref,
                   o_ref, xn_ref, acc_ref, *, eps, inv_f, inv_fm1):
    j = pl.program_id(1)

    @pl.when(j == 0)
    def _():
        # LayerNorm computed once per row tile, cached in VMEM scratch.
        x = x_ref[...].astype(jnp.float32)
        mean = jnp.sum(x, axis=-1, keepdims=True) * inv_f
        diff = x - mean
        var = jnp.sum(diff * diff, axis=-1, keepdims=True) * inv_fm1
        inv = _recip(jnp.sqrt(var) + eps)
        xn_ref[...] = diff * inv * g_ref[...] + bln_ref[...]
        acc_ref[...] = jnp.zeros_like(acc_ref)

    # h tile (tm, tdff) lives only in VMEM/vregs; the (M, DFF) intermediate
    # never touches HBM.
    h = jnp.dot(xn_ref[...], w1_ref[...], preferred_element_type=jnp.float32)
    h = jnp.maximum(h + b1_ref[...], 0.0)
    acc_ref[...] += jnp.dot(h.astype(w2_ref.dtype), w2_ref[...],
                            preferred_element_type=jnp.float32)

    @pl.when(j == pl.num_programs(1) - 1)
    def _():
        o_ref[...] = (acc_ref[...] + b2_ref[...]
                      + x_ref[...].astype(jnp.float32)).astype(o_ref.dtype)


def ln_ffn(x, gamma, beta, w1, b1, w2, b2, *, eps=1e-6):
    """x + (relu(LN(x) @ w1 + b1) @ w2 + b2) — whole FFN sublayer, one kernel."""
    M, D = x.shape
    Dw, DFF = w1.shape
    assert Dw == D and w2.shape == (DFF, D)

    itemsize = x.dtype.itemsize
    tdff = _reduction_tile(DFF, 512, 128)
    tm = M if M <= 512 else 512

    def footprint(tm_):
        blocks = 2 * itemsize * (tm_ * D + D * tdff + tdff + tdff * D + D + tm_ * D)
        scratch = 2 * 4 * tm_ * D
        return blocks + scratch

    while footprint(tm) > _VMEM_BUDGET and tm > 64:
        tm = _round_down(tm // 2, 8)

    grid = (pl.cdiv(M, tm), pl.cdiv(DFF, tdff))
    kernel = functools.partial(_ln_ffn_kernel, eps=float(eps),
                               inv_f=1.0 / D, inv_fm1=1.0 / max(D - 1, 1))

    return pl.pallas_call(
        kernel,
        out_shape=jax.ShapeDtypeStruct((M, D), x.dtype),
        grid_spec=pltpu.PrefetchScalarGridSpec(
            num_scalar_prefetch=0,
            grid=grid,
            in_specs=[
                pl.BlockSpec((tm, D), lambda i, j: (i, 0)),
                pl.BlockSpec((1, D), lambda i, j: (0, 0)),
                pl.BlockSpec((1, D), lambda i, j: (0, 0)),
                pl.BlockSpec((D, tdff), lambda i, j: (0, j)),
                pl.BlockSpec((1, tdff), lambda i, j: (0, j)),
                pl.BlockSpec((tdff, D), lambda i, j: (j, 0)),
                pl.BlockSpec((1, D), lambda i, j: (0, 0)),
            ],
            out_specs=pl.BlockSpec((tm, D), lambda i, j: (i, 0)),
            scratch_shapes=[pltpu.VMEM((tm, D), jnp.float32),
                            pltpu.VMEM((tm, D), jnp.float32)],
        ),
        compiler_params=pltpu.CompilerParams(
            dimension_semantics=("parallel", "arbitrary"),
            vmem_limit_bytes=_VMEM_LIMIT,
        ),
    )(x,
      gamma.reshape(1, D).astype(jnp.float32),
      beta.reshape(1, D).astype(jnp.float32),
      w1, b1.reshape(1, DFF).astype(jnp.float32),
      w2, b2.reshape(1, D).astype(jnp.float32))


# ---------------------------------------------------------------------------
# Full EncoderLayer forward
# ---------------------------------------------------------------------------
def fuse_qkv_params(p):
    """Host-side, once: concatenate the Q/K/V projections into one matmul."""
    p = dict(p)
    p["wqkv"] = jnp.concatenate([p["wq"], p["wk"], p["wv"]], axis=1)
    p["bqkv"] = jnp.concatenate([p["bq"], p["bk"], p["bv"]], axis=0)
    return p


def encoder_layer_forward(x, mask, p):
    """x: (B, S, D); mask: (B, 1, S, S), nonzero = attend (int8 preferred)."""
    B, S, D = x.shape
    H = p["heads"]
    dk = D // H
    M = B * S
    x2 = x.reshape(M, D)
    if mask.dtype != jnp.int8:
        mask = (mask != 0).astype(jnp.int8)

    # Sublayer 0: x + dropout(self_attn(LN1(x), LN1(x), LN1(x), mask))
    qkv = fused_linear(x2, p["wqkv"], p["bqkv"],
                       ln_gamma=p["ln1_g"], ln_beta=p["ln1_b"])          # (M, 3D)
    ctx = _attention(qkv.reshape(B, S, 3 * D), mask,
                     heads=H, dk=dk, scale=1.0 / math.sqrt(dk))          # (B, S, D)
    x1 = fused_linear(ctx.reshape(M, D), p["wo"], p["bo"], residual=x2)  # (M, D)

    # Sublayer 1: x + dropout(feed_forward(LN2(x)))
    out = ln_ffn(x1, p["ln2_g"], p["ln2_b"],
                 p["w1"], p["b1"], p["w2"], p["b2"])
    return out.reshape(B, S, D)


if __name__ == "__main__":
    key = jax.random.PRNGKey(0)
    B, S, D, H, DFF = 2, 8, 128, 4, 256
    keys = jax.random.split(key, 14)

    def w(k, shape, scale=0.1):
        return (scale * jax.random.normal(k, shape)).astype(jnp.float32)

    params = {
        "heads": H,
        "ln1_g": 1.0 + w(keys[0], (D,)),
        "ln1_b": w(keys[1], (D,)),
        "wq": w(keys[2], (D, D)), "bq": w(keys[3], (D,)),
        "wk": w(keys[4], (D, D)), "bk": jnp.zeros((D,), jnp.float32),
        "wv": w(keys[5], (D, D)), "bv": w(keys[6], (D,)),
        "wo": w(keys[7], (D, D)), "bo": w(keys[8], (D,)),
        "ln2_g": 1.0 + w(keys[9], (D,)),
        "ln2_b": w(keys[10], (D,)),
        "w1": w(keys[11], (D, DFF)), "b1": w(keys[12], (DFF,)),
        "w2": w(keys[13], (DFF, D)), "b2": jnp.zeros((D,), jnp.float32),
    }
    params = fuse_qkv_params(params)

    x = jax.random.normal(jax.random.PRNGKey(1), (B, S, D), dtype=jnp.float32)
    # Padding-style mask (int8, nonzero = attend): batch 1 cannot attend to
    # the last 2 key positions.
    mask = jnp.ones((B, 1, S, S), dtype=jnp.int8)
    mask = mask.at[1, :, :, S - 2:].set(0)

    y = jax.block_until_ready(encoder_layer_forward(x, mask, params))

    # ---- pure-JAX reference (same math as the PyTorch modules) -------------
    def ref_ln(t, g, b, eps=1e-6):
        mean = t.mean(-1, keepdims=True)
        var = ((t - mean) ** 2).sum(-1, keepdims=True) / (t.shape[-1] - 1)
        return g * (t - mean) / (jnp.sqrt(var) + eps) + b

    dk = D // H
    xn = ref_ln(x, params["ln1_g"], params["ln1_b"])
    q = (xn @ params["wq"] + params["bq"]).reshape(B, S, H, dk).transpose(0, 2, 1, 3)
    k = (xn @ params["wk"] + params["bk"]).reshape(B, S, H, dk).transpose(0, 2, 1, 3)
    v = (xn @ params["wv"] + params["bv"]).reshape(B, S, H, dk).transpose(0, 2, 1, 3)
    s = jnp.einsum("bhqd,bhkd->bhqk", q, k) / math.sqrt(dk)
    s = jnp.where(mask == 0, -1e9, s)
    a = jax.nn.softmax(s, axis=-1)
    ctx = jnp.einsum("bhqk,bhkd->bhqd", a, v).transpose(0, 2, 1, 3).reshape(B, S, D)
    xr = x + ctx @ params["wo"] + params["bo"]
    xn2 = ref_ln(xr, params["ln2_g"], params["ln2_b"])
    ref = xr + jnp.maximum(xn2 @ params["w1"] + params["b1"], 0.0) @ params["w2"] + params["b2"]

    max_err = float(jnp.max(jnp.abs(y - ref)))
    assert jnp.allclose(y, ref, atol=1e-3, rtol=1e-3), (
        "mismatch vs reference: max abs err = %e" % max_err)
    print("KERNEL_OK")
</pallas_src>

<mosaic_0001>
module attributes {stable_mosaic.version = 11 : i64} {
  func.func @_fused_linear_kernel(%arg0: i32, %arg1: i32, %arg2: memref<16x128xf32, #tpu.memory_space<vmem>>, %arg3: memref<1x128xf32, #tpu.memory_space<vmem>>, %arg4: memref<1x128xf32, #tpu.memory_space<vmem>>, %arg5: memref<128x384xf32, #tpu.memory_space<vmem>>, %arg6: memref<1x384xf32, #tpu.memory_space<vmem>>, %arg7: memref<16x384xf32, #tpu.memory_space<vmem>>) attributes {dimension_semantics = [#tpu.dimension_semantics<parallel>, #tpu.dimension_semantics<parallel>], iteration_bounds = array<i64: 1, 1>, scalar_prefetch = 0 : i64, scratch_operands = 0 : i64, tpu.core_type = #tpu.core_type<tc>, window_params = [{transform_indices = @transform_0, window_bounds = array<i64: 16, 128>}, {pipeline_mode = #tpu.pipeline_mode<synchronous>, transform_indices = @transform_1, window_bounds = array<i64: 1, 128>}, {pipeline_mode = #tpu.pipeline_mode<synchronous>, transform_indices = @transform_2, window_bounds = array<i64: 1, 128>}, {transform_indices = @transform_3, window_bounds = array<i64: 128, 384>}, {transform_indices = @transform_4, window_bounds = array<i64: 1, 384>}, {transform_indices = @transform_5, window_bounds = array<i64: 16, 384>}]} {
    %c0 = arith.constant 0 : index
    %c0_0 = arith.constant 0 : index
    %0 = vector.load %arg2[%c0, %c0_0] : memref<16x128xf32, #tpu.memory_space<vmem>>, vector<16x128xf32>
    %cst = arith.constant dense<0.000000e+00> : vector<16xf32>
    %1 = vector.multi_reduction <add>, %0, %cst [1] : vector<16x128xf32> to vector<16xf32>
    %2 = vector.shape_cast %1 : vector<16xf32> to vector<16x1xf32>
    %cst_1 = arith.constant 7.812500e-03 : f32
    %3 = vector.broadcast %cst_1 : f32 to vector<16x1xf32>
    %4 = arith.mulf %2, %3 : vector<16x1xf32>
    %5 = vector.broadcast %4 : vector<16x1xf32> to vector<16x128xf32>
    %6 = arith.subf %0, %5 : vector<16x128xf32>
    %7 = arith.mulf %6, %6 : vector<16x128xf32>
    %cst_2 = arith.constant dense<0.000000e+00> : vector<16xf32>
    %8 = vector.multi_reduction <add>, %7, %cst_2 [1] : vector<16x128xf32> to vector<16xf32>
    %9 = vector.shape_cast %8 : vector<16xf32> to vector<16x1xf32>
    %cst_3 = arith.constant 0.00787401571 : f32
    %10 = vector.broadcast %cst_3 : f32 to vector<16x1xf32>
    %11 = arith.mulf %9, %10 : vector<16x1xf32>
    %12 = math.sqrt %11 : vector<16x1xf32>
    %cst_4 = arith.constant 9.99999997E-7 : f32
    %13 = vector.broadcast %cst_4 : f32 to vector<16x1xf32>
    %14 = arith.addf %12, %13 : vector<16x1xf32>
    %15 = tpu.reciprocal %14 {approx = true} : vector<16x1xf32> -> vector<16x1xf32>
    %16 = arith.mulf %14, %15 : vector<16x1xf32>
    %cst_5 = arith.constant 2.000000e+00 : f32
    %17 = vector.broadcast %cst_5 : f32 to vector<16x1xf32>
    %18 = arith.subf %17, %16 : vector<16x1xf32>
    %19 = arith.mulf %15, %18 : vector<16x1xf32>
    %20 = vector.broadcast %19 : vector<16x1xf32> to vector<16x128xf32>
    %21 = arith.mulf %6, %20 : vector<16x128xf32>
    %c0_6 = arith.constant 0 : index
    %c0_7 = arith.constant 0 : index
    %22 = vector.load %arg3[%c0_6, %c0_7] : memref<1x128xf32, #tpu.memory_space<vmem>>, vector<1x128xf32>
    %23 = vector.broadcast %22 : vector<1x128xf32> to vector<16x128xf32>
    %24 = arith.mulf %21, %23 : vector<16x128xf32>
    %c0_8 = arith.constant 0 : index
    %c0_9 = arith.constant 0 : index
    %25 = vector.load %arg4[%c0_8, %c0_9] : memref<1x128xf32, #tpu.memory_space<vmem>>, vector<1x128xf32>
    %26 = vector.broadcast %25 : vector<1x128xf32> to vector<16x128xf32>
    %27 = arith.addf %24, %26 : vector<16x128xf32>
    %c0_10 = arith.constant 0 : index
    %c0_11 = arith.constant 0 : index
    %28 = vector.load %arg5[%c0_10, %c0_11] : memref<128x384xf32, #tpu.memory_space<vmem>>, vector<128x384xf32>
    %cst_12 = arith.constant dense<0.000000e+00> : vector<16x384xf32>
    %29 = tpu.matmul %27, %28, %cst_12 {dimension_numbers = #tpu.dot_dimension_numbers<[1], [0], [0], [1], [0, 0, 1, 1], [], []>} : vector<16x128xf32>, vector<128x384xf32>, vector<16x384xf32> -> vector<16x384xf32>
    %c0_13 = arith.constant 0 : index
    %c0_14 = arith.constant 0 : index
    %30 = vector.load %arg6[%c0_13, %c0_14] : memref<1x384xf32, #tpu.memory_space<vmem>>, vector<1x384xf32>
    %31 = vector.broadcast %30 : vector<1x384xf32> to vector<16x384xf32>
    %32 = arith.addf %29, %31 : vector<16x384xf32>
    %c0_15 = arith.constant 0 : index
    %c0_16 = arith.constant 0 : index
    %33 = vector.load %arg7[%c0_15, %c0_16] : memref<16x384xf32, #tpu.memory_space<vmem>>, vector<16x384xf32>
    tpu.vector_store %arg7[%c0_15, %c0_16], %32 {strides = array<i32>} : memref<16x384xf32, #tpu.memory_space<vmem>>, vector<16x384xf32>,
    return
  }
  func.func @transform_0(%arg0: i32, %arg1: i32) -> (i32, i32) {
    %c0_i32 = arith.constant 0 : i32
    %c0_i32_0 = arith.constant 0 : i32
    return %arg1, %c0_i32 : i32, i32
  }
  func.func @transform_1(%arg0: i32, %arg1: i32) -> (i32, i32) {
    %c0_i32 = arith.constant 0 : i32
    %c0_i32_0 = arith.constant 0 : i32
    %c0_i32_1 = arith.constant 0 : i32
    return %c0_i32, %c0_i32_0 : i32, i32
  }
  func.func @transform_2(%arg0: i32, %arg1: i32) -> (i32, i32) {
    %c0_i32 = arith.constant 0 : i32
    %c0_i32_0 = arith.constant 0 : i32
    %c0_i32_1 = arith.constant 0 : i32
    return %c0_i32, %c0_i32_0 : i32, i32
  }
  func.func @transform_3(%arg0: i32, %arg1: i32) -> (i32, i32) {
    %c0_i32 = arith.constant 0 : i32
    %c0_i32_0 = arith.constant 0 : i32
    return %c0_i32, %arg0 : i32, i32
  }
  func.func @transform_4(%arg0: i32, %arg1: i32) -> (i32, i32) {
    %c0_i32 = arith.constant 0 : i32
    %c0_i32_0 = arith.constant 0 : i32
    return %c0_i32, %arg0 : i32, i32
  }
  func.func @transform_5(%arg0: i32, %arg1: i32) -> (i32, i32) {
    %c0_i32 = arith.constant 0 : i32
    return %arg1, %arg0 : i32, i32
  }
}

</mosaic_0001>

<bundles_post_ra>
// kernel: tpu_custom_call.1
= control target key start
LH: loop header
LB: loop body
LE: loop exit
PB: predicated region body
PF: predicated region fallthrough
CT: control target
= control target key end

     0   :  { %10 = vsyncpa [#allocation3], 0  ;;  %s660_s0 = inlined_call_operand.hbm [shape: f32[16,128], index: 0, kind: input, shape index: {}]   ;;  %s661_s1 = inlined_call_operand.vmem [shape: f32[1,128], index: 1, kind: input, shape index: {}]   ;;  %s662_s2 = inlined_call_operand.vmem [shape: f32[1,128], index: 2, kind: input, shape index: {}]   ;;  %s663_s3 = inlined_call_operand.hbm [shape: f32[128,384], index: 3, kind: input, shape index: {}]   ;;  %s664_s4 = inlined_call_operand.vmem [shape: f32[1,384], index: 4, kind: input, shape index: {}]   ;;  %s665_s5 = inlined_call_operand.hbm [shape: f32[16,384], index: 5, kind: output, shape index: {}]  }
   0x1   :  { %11 = vsyncpa [#allocation6], 0 }
   0x2   :  { %12 = vsyncpa [#allocation4], 0  ;;  %s559_s18 = smov [#allocation2]   ;;  %s487_s22 = scalar_lea.hbm %s660_s0, 256 }
   0x3   :  { %s18_s19 = sshll.u32 %s559_s18, 4  ;;  %p488_p0 = scmp.ne.s32.totalorder %s660_s0, %s487_s22  ;;  %s19_s19 = int_to_ptr.vmem [resolvable:$true] %s18_s19 }
   0x4   :  { %p491_p1 = scmp.lt.u32.totalorder %s487_s22, %s660_s0 }
   0x6   :  { %p493_p2 = pnand %p491_p1, %p488_p0 }
   0x8   :  { %496 = shalt.err (!%p493_p2)
}
   0x9   :  { %s497_s27 = scalar_lea.vmem %s19_s19, 256  ;;  %p502_p4 = scmp.lt.s32.totalorder %s19_s19, %s19_s19 }
   0xa   :  { %p498_p3 = scmp.ne.s32.totalorder %s19_s19, %s497_s27  ;;  %p503_p5 = scmp.lt.s32.totalorder %s497_s27, %s497_s27 }
   0xc   :  { %p504_p6 = por %p503_p5, %p502_p4 }
   0xe   :  { %p505_p7 = pnand %p504_p6, %p498_p3 }
  0x10   :  { %508 = shalt.err (!%p505_p7)
}
  0x11   :  { %s560_s28 = smov 128   ;;  %s561_s29 = smov 8  }
  0x12   :  { %24 = dma.hbm_to_vmem [thread:$0]  %s660_s0, 256, %s19_s19, [#allocation3], %s560_s28, %s560_s28, %s561_s29  }
  0x13   :  { %s562_s7 = smov [#allocation5]   ;;  %s509_s11 = scalar_lea.hbm %s663_s3, 6144 }
  0x14   :  { %s34_s8 = sshll.u32 %s562_s7, 4  ;;  %p510_p8 = scmp.ne.s32.totalorder %s663_s3, %s509_s11  ;;  %s35_s8 = int_to_ptr.vmem [resolvable:$true] %s34_s8 }
  0x15   :  { %p513_p9 = scmp.lt.u32.totalorder %s509_s11, %s663_s3 }
  0x17   :  { %p515_p10 = pnand %p513_p9, %p510_p8 }
  0x19   :  { %518 = shalt.err (!%p515_p10)
}
  0x1a   :  { %s519_s16 = scalar_lea.vmem %s35_s8, 6144  ;;  %p524_p12 = scmp.lt.s32.totalorder %s35_s8, %s35_s8 }
  0x1b   :  { %p520_p11 = scmp.ne.s32.totalorder %s35_s8, %s519_s16  ;;  %p525_p13 = scmp.lt.s32.totalorder %s519_s16, %s519_s16 }
  0x1d   :  { %p526_p0 = por %p525_p13, %p524_p12 }
  0x1f   :  { %p527_p1 = pnand %p526_p0, %p520_p11 }
  0x21   :  { %530 = shalt.err (!%p527_p1)
}
  0x22   :  { %s563_s0 = smov 384   ;;  %s564_s17 = smov 24  }
  0x23   :  { %40 = dma.hbm_to_vmem [thread:$0]  %s663_s3, 6144, %s35_s8, [#allocation6], %s563_s0, %s563_s0, %s564_s17  }
  0x24   :  { %553 = dma.done.wait [#allocation3], 256  }
  0x25   :  { %554 = vsyncadd [#allocation3], 4294967040 }
  0x26   :  { %555 = dma.done.wait [#allocation6], 6144  }
  0x27   :  { %556 = vsyncadd [#allocation6], 4294961152  ;;  %v49_v0 = vld [vmem:[#allocation2] sm:$0xff]  ;;  %v50_v1 = vld [vmem:[#allocation2 + $0x8] sm:$0xff]  ;;  %v565_v41 = vmov 0.0  }
  0x28   :  { %51 = vadd.xlane.f32.xlu0 %v49_v0  ;;  %v112_v10 = vld [vmem:[#allocation5 + $0x8] sm:$0xff]  ;;  %v115_v11 = vld [vmem:[#allocation5 + $0x20] sm:$0xff]  ;;  %v114_v14 = vld [vmem:[#allocation5 + $0x18] sm:$0xff]  ;;  %240 = vmatprep.mubr.f32.mxu0 %v565_v41 }
  0x29   :  { %v407_v12 = vpack.c.bf16 %v115_v11, %v112_v10  ;;  %v111_v13 = vld [vmem:[#allocation5] sm:$0xff]  ;;  %v118_v16 = vld [vmem:[#allocation5 + $0x38] sm:$0xff]  ;;  %v121_v17 = vld [vmem:[#allocation5 + $0x50] sm:$0xff] }
  0x2a   :  { %v409_v15 = vpack.c.bf16 %v114_v14, %v111_v13  ;;  %v113_v18 = vld [vmem:[#allocation5 + $0x10] sm:$0xff]  ;;  %v411_v19 = vpack.c.bf16 %v121_v17, %v118_v16  ;;  %v116_v20 = vld [vmem:[#allocation5 + $0x28] sm:$0xff]  ;;  %v127_v26 = vld [vmem:[#allocation5 + $0x80] sm:$0xff] }
  0x2b   :  { %408 = vmatprep.subr.bf16.mxu0 %v407_v12  ;;  %v117_v21 = vld [vmem:[#allocation5 + $0x30] sm:$0xff]  ;;  %v120_v22 = vld [vmem:[#allocation5 + $0x48] sm:$0xff]  ;;  %v439_v23 = vpack.c.bf16 %v116_v20, %v113_v18  ;;  %v119_v27 = vld [vmem:[#allocation5 + $0x40] sm:$0xff] }
  0x2c   :  { %53 = vadd.xlane.f32.xlu0 %v50_v1  ;;  %410 = vmatpush1.bf16.msra.mxu0 %v409_v15  ;;  %v413_v24 = vpack.c.bf16 %v120_v22, %v117_v21  ;;  %v124_v25 = vld [vmem:[#allocation5 + $0x68] sm:$0xff]  ;;  %v122_v29 = vld [vmem:[#allocation5 + $0x58] sm:$0xff]  ;;  %v123_v30 = vld [vmem:[#allocation5 + $0x60] sm:$0xff] }
  0x2d   :  { %412 = vmatprep.subr.bf16.mxu0 %v411_v19  ;;  %440 = vmatprep.subr.bf16.mxu1 %v439_v23  ;;  %v415_v28 = vpack.c.bf16 %v127_v26, %v124_v25  ;;  %v126_v31 = vld [vmem:[#allocation5 + $0x78] sm:$0xff]  ;;  %v443_v32 = vpack.c.bf16 %v122_v29, %v119_v27  ;;  %v133_v35 = vld [vmem:[#allocation5 + $0xb0] sm:$0xff]  ;;  %v128_v38 = vld [vmem:[#allocation5 + $0x88] sm:$0xff] }
  0x2e   :  { %442 = vmatpush3.bf16.msra.mxu1 %v439_v23  ;;  %v417_v33 = vpack.c.bf16 %v126_v31, %v123_v30  ;;  %v130_v34 = vld [vmem:[#allocation5 + $0x98] sm:$0xff]  ;;  %v125_v36 = vld [vmem:[#allocation5 + $0x70] sm:$0xff]  ;;  %v132_v40 = vld [vmem:[#allocation5 + $0xa8] sm:$0xff] }
  0x2f   :  { %v419_v37 = vpack.c.bf16 %v133_v35, %v130_v34  ;;  %v129_v39 = vld [vmem:[#allocation5 + $0x90] sm:$0xff]  ;;  %444 = vmatprep.subr.bf16.mxu1 %v443_v32  ;;  %v447_v42 = vpack.c.bf16 %v128_v38, %v125_v36  ;;  %v136_v44 = vld [vmem:[#allocation5 + $0xc8] sm:$0xff]  ;;  %v139_v45 = vld [vmem:[#allocation5 + $0xe0] sm:$0xff] }
  0x30   :  { %414 = vmatpush1.bf16.msra.mxu0 %v413_v24  ;;  %v421_v43 = vpack.c.bf16 %v132_v40, %v129_v39  ;;  %v131_v46 = vld [vmem:[#allocation5 + $0xa0] sm:$0xff]  ;;  %v423_v47 = vpack.c.bf16 %v139_v45, %v136_v44  ;;  %v134_v48 = vld [vmem:[#allocation5 + $0xb8] sm:$0xff]  ;;  %v145_v53 = vld [vmem:[#allocation5 + $0x110] sm:$0xff] }
  0x31   :  { %416 = vmatprep.subr.bf16.mxu0 %v415_v28  ;;  %v135_v49 = vld [vmem:[#allocation5 + $0xc0] sm:$0xff]  ;;  %v138_v50 = vld [vmem:[#allocation5 + $0xd8] sm:$0xff]  ;;  %v451_v51 = vpack.c.bf16 %v134_v48, %v131_v46  ;;  %v137_v54 = vld [vmem:[#allocation5 + $0xd0] sm:$0xff] }
  0x32   :  { %446 = vmatpush3.bf16.msra.mxu1 %v443_v32  ;;  %v142_v52 = vld [vmem:[#allocation5 + $0xf8] sm:$0xff]  ;;  %v140_v55 = vld [vmem:[#allocation5 + $0xe8] sm:$0xff]  ;;  %v425_v56 = vpack.c.bf16 %v138_v50, %v135_v49  ;;  %v141_v58 = vld [vmem:[#allocation5 + $0xf0] sm:$0xff] }
  0x33   :  { %448 = vmatprep.subr.bf16.mxu1 %v447_v42  ;;  %v427_v57 = vpack.c.bf16 %v145_v53, %v142_v52  ;;  %v144_v59 = vld [vmem:[#allocation5 + $0x108] sm:$0xff]  ;;  %v455_v60 = vpack.c.bf16 %v140_v55, %v137_v54  ;;  %v151_v62 = vld [vmem:[#allocation5 + $0x140] sm:$0xff]  ;;  %v149_v10 = vld [vmem:[#allocation5 + $0x130] sm:$0xff]  ;;  %v161_v54 = vlaneseq }
  0x34   :  { %418 = vmatpush1.bf16.msra.mxu0 %v417_v33  ;;  %v148_v61 = vld [vmem:[#allocation5 + $0x128] sm:$0xff]  ;;  %v143_v63 = vld [vmem:[#allocation5 + $0x100] sm:$0xff]  ;;  %v153_v14 = vld [vmem:[#allocation5 + $0x150] sm:$0xff] }
  0x35   :  { %420 = vmatprep.subr.bf16.mxu0 %v419_v37  ;;  %v152_v11 = vld [vmem:[#allocation5 + $0x148] sm:$0xff]  ;;  %v155_v18 = vld [vmem:[#allocation5 + $0x160] sm:$0xff]  ;;  %v158_v19 = vld [vmem:[#allocation5 + $0x178] sm:$0xff] }
  0x36   :  { %450 = vmatpush3.bf16.msra.mxu1 %v447_v42  ;;  %v156_v15 = vld [vmem:[#allocation5 + $0x168] sm:$0xff]  ;;  %v463_v16 = vpack.c.bf16 %v152_v11, %v149_v10  ;;  %v467_v20 = vpack.c.bf16 %v158_v19, %v155_v18  ;;  %v352_v44 = vld [vmem:[%s661_s1] ss:$0 sm:$0xff] }
  0x37   :  { %452 = vmatprep.subr.bf16.mxu1 %v451_v51  ;;  %v437_v17 = vpack.c.bf16 %v156_v15, %v153_v14 }
  0x38   :  { %422 = vmatpush1.bf16.msra.mxu0 %v421_v43 }
  0x39   :  { %424 = vmatprep.subr.bf16.mxu0 %v423_v47  ;;  %v353_v47 = vld [vmem:[%s662_s2] ss:$0 sm:$0xff]  ;;  %s566_s2 = smov [#allocation7]  }
  0x3a   :  { %454 = vmatpush3.bf16.msra.mxu1 %v451_v51  ;;  %s339_s24 = sshll.u32 %s566_s2, 4  ;;  %s340_s24 = int_to_ptr.vmem [resolvable:$true] %s339_s24 }
  0x3b   :  { %456 = vmatprep.subr.bf16.mxu1 %v455_v60  ;;  %p536_p3 = scmp.lt.s32.totalorder %s340_s24, %s340_s24 }
  0x3c   :  { %426 = vmatpush1.bf16.msra.mxu0 %v425_v56  ;;  %v159_v56 = vld [vmem:[%s664_s4] sm:$0x7]  ;;  %s531_s4 = scalar_lea.vmem %s340_s24, 768 }
  0x3d   :  { %428 = vmatprep.subr.bf16.mxu0 %v427_v57  ;;  %p532_p2 = scmp.ne.s32.totalorder %s340_s24, %s531_s4  ;;  %p537_p4 = scmp.lt.s32.totalorder %s531_s4, %s531_s4 }
  0x3e   :  { %458 = vmatpush3.bf16.msra.mxu1 %v455_v60 }
  0x3f   :  { %p538_p5 = por %p537_p4, %p536_p3 }
  0x41   :  { %p539_p6 = pnand %p538_p5, %p532_p2 }
  0xb5   :  { %v52_v2 = vpop.xlane.xlu0 %51 }
  0xb6   :  { %v55_v3 = vmul.f32 0.0078125, %v52_v2  ;;  %v431_v2 = vpack.c.bf16 %v151_v62, %v148_v61 }
  0xb8   :  { %v624_v4 = vsub.f32 %v49_v0, %v55_v3  ;;  %v146_v0 = vld [vmem:[#allocation5 + $0x118] sm:$0xff]  ;;  %v147_v3 = vld [vmem:[#allocation5 + $0x120] sm:$0xff] }
  0xb9   :  { %v54_v5 = vpop.xlane.xlu0 %53 }
  0xba   :  { %v56_v6 = vmul.f32 0.0078125, %v54_v5  ;;  %v59_v7 = vmul.f32 %v624_v4, %v624_v4  ;;  %v150_v5 = vld [vmem:[#allocation5 + $0x138] sm:$0xff] }
  0xbb   :  { %v433_v12 = vpack.c.bf16 %v150_v5, %v147_v3 }
  0xbc   :  { %v628_v8 = vsub.f32 %v50_v1, %v56_v6  ;;  %61 = vadd.xlane.f32.xlu1 %v59_v7  ;;  %v429_v1 = vpack.c.bf16 %v144_v59, %v141_v58  ;;  %v459_v6 = vpack.c.bf16 %v146_v0, %v143_v63  ;;  %v154_v7 = vld [vmem:[#allocation5 + $0x158] sm:$0xff] }
  0xbe   :  { %v60_v9 = vmul.f32 %v628_v8, %v628_v8  ;;  %430 = vmatpush1.bf16.msra.mxu0 %v429_v1  ;;  %460 = vmatprep.subr.bf16.mxu1 %v459_v6 }
  0xbf   :  { %432 = vmatprep.subr.bf16.mxu0 %v431_v2  ;;  %462 = vmatpush3.bf16.msra.mxu1 %v459_v6 }
  0xc0   :  { %63 = vadd.xlane.f32.xlu1 %v60_v9  ;;  %v157_v9 = vld [vmem:[#allocation5 + $0x170] sm:$0xff]  ;;  %464 = vmatprep.subr.bf16.mxu1 %v463_v16 }
  0xc1   :  { %v435_v13 = vpack.c.bf16 %v157_v9, %v154_v7 }
  0xc2   :  { %434 = vmatpush1.bf16.msra.mxu0 %v433_v12 }
  0xc3   :  { %436 = vmatprep.subr.bf16.mxu0 %v435_v13  ;;  %466 = vmatpush3.bf16.msra.mxu1 %v463_v16 }
  0xc4   :  { %468 = vmatprep.subr.bf16.mxu1 %v467_v20 }
  0xc6   :  { %438 = vmatpush1.bf16.msra.mxu0 %v437_v17 }
  0xc7   :  { %470 = vmatpush3.bf16.msra.mxu1 %v467_v20 }
 0x149   :  { %v62_v21 = vpop.xlane.xlu1 %61 }
 0x14a   :  { %v65_v22 = vmul.f32 0.007874016, %v62_v21 }
 0x14c   :  { %479 = vrsqrt.f32 %v65_v22  ;;  %vm69_vm0 = vcmp.eq.f32.partialorder %v65_v22, inf  ;;  %v72_v27 = vand.u32 2147483648, %v65_v22  ;;  %vm71_vm1 = vcmp.eq.f32.partialorder %v65_v22, 0.0 }
 0x14d   :  { %v64_v23 = vpop.xlane.xlu1 %63 }
 0x14e   :  { %v66_v24 = vmul.f32 0.007874016, %v64_v23 }
 0x150   :  { %481 = vrsqrt.f32 %v66_v24  ;;  %vm76_vm2 = vcmp.eq.f32.partialorder %v66_v24, inf  ;;  %v79_v33 = vand.u32 2147483648, %v66_v24  ;;  %vm78_vm3 = vcmp.eq.f32.partialorder %v66_v24, 0.0 }
 0x156   :  { %v480_v25 = vpop.eup %479 }
 0x157   :  { %v68_v26 = vmul.f32 %v480_v25, %v65_v22 }
 0x159   :  { %v70_v28 = vsel %vm69_vm0, %v65_v22, %v68_v26 }
 0x15a   :  { %v482_v29 = vpop.eup %481  ;;  %v73_v30 = vsel %vm71_vm1, %v72_v27, %v70_v28 }
 0x15b   :  { %v75_v31 = vmul.f32 %v482_v29, %v66_v24  ;;  %v81_v32 = vadd.f32 1e-06, %v73_v30 }
 0x15d   :  { %483 = vrcp.f32 %v81_v32  ;;  %v77_v34 = vsel %vm76_vm2, %v66_v24, %v75_v31 }
 0x15e   :  { %v80_v35 = vsel %vm78_vm3, %v79_v33, %v77_v34 }
 0x15f   :  { %v82_v36 = vadd.f32 1e-06, %v80_v35 }
 0x161   :  { %485 = vrcp.f32 %v82_v36 }
 0x167   :  { %v484_v37 = vpop.eup %483 }
 0x168   :  { %v85_v38 = vmul.f32 %v484_v37, %v81_v32 }
 0x16a   :  { %v87_v39 = vsub.f32 2.0, %v85_v38 }
 0x16b   :  { %v486_v40 = vpop.eup %485 }
 0x16c   :  { %v89_v42 = vmul.f32 %v484_v37, %v87_v39  ;;  %v86_v43 = vmul.f32 %v486_v40, %v82_v36 }
 0x16e   :  { %v91_v45 = vmul.f32 %v89_v42, %v624_v4  ;;  %v88_v46 = vsub.f32 2.0, %v86_v43  ;;  %v162_v4 = vshrl.u32 %v161_v54, 7 }
 0x170   :  { %v100_v48 = vmul.f32 %v352_v44, %v91_v45  ;;  %v90_v49 = vmul.f32 %v486_v40, %v88_v46  ;;  %v163_v55 = vsub.s32 0, %v162_v4  ;;  %v167_v57 = vsub.s32 1, %v162_v4 }
 0x171   :  { %v171_v59 = vsub.s32 2, %v162_v4 }
 0x172   :  { %v109_v50 = vadd.f32 %v353_v47, %v100_v48  ;;  %v92_v51 = vmul.f32 %v90_v49, %v628_v8  ;;  %v164_v58 = vrot.slane %v159_v56, %v163_v55  ;;  %v168_v60 = vrot.slane %v159_v56, %v167_v57 }
 0x173   :  { %v172_v63 = vrot.slane %v159_v56, %v171_v59 }
 0x174   :  { %241 = vmatmul.mubr.f32.vlgmr.msra.gmra.mrb[0].mxu0 %v109_v50  ;;  %404 = vmatprep.mubr.f32.mxu1 %v109_v50  ;;  %v101_v52 = vmul.f32 %v352_v44, %v92_v51 }
 0x175   :  { %246 = vmatprep.mubr.f32.mxu0 %v565_v41 }
 0x176   :  { %v110_v53 = vadd.f32 %v353_v47, %v101_v52 }
 0x178   :  { %247 = vmatmul.mubr.f32.gmra.mrb[2].mxu0 %v110_v53  ;;  %405 = vmatmul.mubr.f32.vlgmr.msra.gmra.mrb[0].mxu1 %v110_v53 }
 0x247   :  { %v242_v8 = vpop.f32.mrb[0].mxu0 }
 0x248   :  { %v243_v61 = vadd.f32 %v242_v8, %v164_v58  ;;  %v244_v62 = vpop.f32.mrb[1].mxu0 }
 0x249   :  { %v245_v0 = vadd.f32 %v244_v62, %v168_v60 }
 0x24a   :  { %328 = vst [vmem:[#allocation7] sm:$0xff] %v243_v61 }
 0x24b   :  { %329 = vst [vmem:[#allocation7 + $0x8] sm:$0xff] %v245_v0  ;;  %v248_v41 = vpop.f32.mrb[2].mxu0  ;;  %v406_v1 = vpop.f32.mrb[0].mxu1 }
 0x24c   :  { %v249_v2 = vadd.f32 %v248_v41, %v164_v58  ;;  %v325_v3 = vadd.f32 %v406_v1, %v172_v63  ;;  %v250_v5 = vpop.f32.mrb[3].mxu0  ;;  %v319_v6 = vpop.f32.mrb[1].mxu1 }
 0x24d   :  { %v251_v7 = vadd.f32 %v250_v5, %v168_v60  ;;  %v320_v9 = vadd.f32 %v319_v6, %v172_v63 }
 0x24e   :  { %331 = vst [vmem:[#allocation7 + $0x18] sm:$0xff] %v249_v2  ;;  %333 = vst [vmem:[#allocation7 + $0x28] sm:$0xff] %v325_v3 }
 0x24f   :  { %332 = vst [vmem:[#allocation7 + $0x20] sm:$0xff] %v251_v7  ;;  %330 = vst [vmem:[#allocation7 + $0x10] sm:$0xff] %v320_v9 }
 0x250   :  { %542 = shalt.err (!%p539_p6)
}
 0x251   :  { %s543_s27 = scalar_lea.hbm %s665_s5, 768 }
 0x252   :  { %p544_p7 = scmp.ne.s32.totalorder %s665_s5, %s543_s27  ;;  %p547_p8 = scmp.lt.u32.totalorder %s543_s27, %s665_s5 }
 0x254   :  { %p549_p9 = pnand %p547_p8, %p544_p7 }
 0x256   :  { %552 = shalt.err (!%p549_p9)
}
 0x257   :  { %345 = dma.vmem_to_hbm [thread:$0]  %s340_s24, 768, %s665_s5, [#allocation4], %s563_s0, %s563_s0, %s564_s17  }
 0x258   :  { %557 = dma.done.wait [#allocation4], 768  }
 0x259   :  { %558 = vsyncadd [#allocation4], 4294966528 }
 0x25a   :  { %349 = vsyncpa [#allocation3], 1 }
 0x25b   :  { %350 = vsyncpa [#allocation6], 1 }
 0x25c   :  { %351 = vsyncpa [#allocation4], 1 }

</bundles_post_ra>
